<compile_context>
chip_gen: v5e
topology: v5e:2x2
jax: 0.10.0
libtpu: 0.0.40
codegen_flags: <defaults>
</compile_context>

<pallas_src>
import functools
import math

import jax
import jax.numpy as jnp
from jax import lax
from jax.experimental import pallas as pl
from jax.experimental.pallas import tpu as pltpu


def _round_up(x: int, m: int) -> int:
    return -(-x // m) * m


def _vmem_est(tq: int, tk: int, dp: int) -> int:
    # double-buffered query halves + double-buffered key tile + stacked-query
    # scratch + (sim, exp) f32 temporaries, all in bytes.
    return 4 * (4 * tq * dp + 2 * tk * dp + 2 * tq * dp + 4 * tq * tk)


def _choose_tiles(n: int, dp: int):
    """Pick (row tile tq, key tile tk over 2*Np rows, padded half-batch Np)."""
    budget = 26 << 20          # keep well under the 56 MiB vmem_limit we request
    n8 = _round_up(n, 8)

    tq = min(8, n8)            # fallback
    for cand in (512, 256, 128, 64, 32, 16, 8):
        t = min(cand, n8)
        np_c = _round_up(n, t)
        pad = np_c - n
        if _vmem_est(t, t, dp) <= budget and pad * 8 <= max(np_c, 64):
            tq = t
            break

    np_ = _round_up(n, tq)
    m = np_ // tq

    tk = tq                    # k=1 always divides 2m
    for k in range(2 * m, 0, -1):
        if (2 * m) % k:
            continue
        cand_tk = tq * k
        if cand_tk > 2048:
            continue
        if _vmem_est(tq, cand_tk, dp) <= budget:
            tk = cand_tk
            break
    return tq, tk, np_


def _simclr_kernel(q1_ref, q2_ref, k_ref,            # inputs (same array, 3 views)
                   out1_ref, out2_ref,                # per-row loss outputs
                   qs_s, pos_s, se_s,                 # VMEM scratch
                   *, inv_t: float, n: int, np_: int, tq: int):
    i = pl.program_id(0)
    j = pl.program_id(1)
    nk = pl.num_programs(1)
    tk = k_ref.shape[0]

    @pl.when(j == 0)
    def _init():
        q1 = q1_ref[...]
        q2 = q2_ref[...]
        # Stack the two (already normalized & sqrt(1/T)-scaled) query halves.
        qs_s[0:tq, :] = q1
        qs_s[tq:2 * tq, :] = q2
        # Positive logit: <z1n_i, z2n_i>/T (both operands carry sqrt(1/T)).
        pos_s[...] = jnp.sum(q1.astype(jnp.float32) * q2.astype(jnp.float32),
                             axis=1, keepdims=True)
        se_s[...] = jnp.zeros_like(se_s)

    # One fused MXU dot per step: (2tq, dp) x (tk, dp)^T -> (2tq, tk).
    s = lax.dot_general(qs_s[...], k_ref[...], (((1,), (1,)), ((), ())),
                        preferred_element_type=jnp.float32)

    # Constant shift 1/T: rows are (near-)unit norm so every logit <= ~1/T and the
    # exp never overflows; no row max needed.
    p = jnp.exp(s - inv_t)

    # Explicit masking of the diagonal (and padded key columns): cheap broadcasted
    # index compares, fully hidden under the EUP exp, and numerically exact (no
    # log(se - 1) cancellation).
    row = lax.broadcasted_iota(jnp.int32, (2 * tq, 1), 0)
    g_r = i * tq + jnp.where(row < tq, row, row + (np_ - tq))   # global row idx
    col = lax.broadcasted_iota(jnp.int32, (1, tk), 1)
    g_c = j * tk + col                                          # global col idx
    valid = g_r != g_c
    if n != np_:   # static: only emit the pad mask when row padding exists
        g_c_half = jnp.where(g_c < np_, g_c, g_c - np_)
        valid = jnp.logical_and(valid, g_c_half < n)
    p = jnp.where(valid, p, 0.0)

    se_s[...] += jnp.sum(p, axis=1, keepdims=True)

    @pl.when(j == nk - 1)
    def _finalize():
        pos = pos_s[...]
        # loss_r = logsumexp_{c != r}(sim) - pos_r = log(se) + 1/T - pos
        out1_ref[...] = jnp.log(se_s[0:tq, :]) + inv_t - pos
        out2_ref[...] = jnp.log(se_s[tq:2 * tq, :]) + inv_t - pos


def simclr_loss_pallas(z1: jax.Array, z2: jax.Array, temperature: float = 0.2,
                       use_bf16_matmul: bool = False) -> jax.Array:
    assert z1.shape == z2.shape and z1.ndim == 2
    n, d = z1.shape
    inv_t = 1.0 / float(temperature)

    dp = max(128, _round_up(d, 128))          # lane-dense feature dim
    tq, tk, np_ = _choose_tiles(n, dp)
    m = np_ // tq
    nkv = (2 * np_) // tk

    # Hoisted preprocessing (one cheap XLA pass): pad rows/features with zeros,
    # L2-normalize, scale BOTH sides by sqrt(1/T) so sim = z.z / T with no
    # per-step scaling inside the kernel.  Zero pad rows stay exactly zero.
    scale = math.sqrt(inv_t)

    def prep(z):
        z = z.astype(jnp.float32)
        z = jnp.pad(z, ((0, np_ - n), (0, dp - d)))
        ss = jnp.sum(z * z, axis=1, keepdims=True)
        return z * (lax.rsqrt(jnp.maximum(ss, 1e-24)) * scale)

    zc = jnp.concatenate([prep(z1), prep(z2)], axis=0)        # (2*np_, dp)
    op_dtype = jnp.bfloat16 if use_bf16_matmul else jnp.float32
    zc = zc.astype(op_dtype)

    kernel = functools.partial(_simclr_kernel, inv_t=inv_t, n=n, np_=np_, tq=tq)

    out1, out2 = pl.pallas_call(
        kernel,
        out_shape=(jax.ShapeDtypeStruct((np_, 1), jnp.float32),
                   jax.ShapeDtypeStruct((np_, 1), jnp.float32)),
        grid_spec=pltpu.PrefetchScalarGridSpec(
            num_scalar_prefetch=0,
            grid=(m, nkv),
            in_specs=[
                pl.BlockSpec((tq, dp), lambda i, j: (i, 0)),        # query half 1
                pl.BlockSpec((tq, dp), lambda i, j: (i + m, 0)),    # query half 2
                pl.BlockSpec((tk, dp), lambda i, j: (j, 0)),        # key tile
            ],
            out_specs=[
                pl.BlockSpec((tq, 1), lambda i, j: (i, 0)),
                pl.BlockSpec((tq, 1), lambda i, j: (i, 0)),
            ],
            scratch_shapes=[
                pltpu.VMEM((2 * tq, dp), op_dtype),    # stacked query tile
                pltpu.VMEM((tq, 1), jnp.float32),      # positive logit
                pltpu.VMEM((2 * tq, 1), jnp.float32),  # sum-exp accumulator
            ],
        ),
        compiler_params=pltpu.CompilerParams(
            dimension_semantics=("parallel", "arbitrary"),
            vmem_limit_bytes=56 * 1024 * 1024,
        ),
    )(zc, zc, zc)

    # Mean of the 2N real per-row cross-entropy terms (padded rows discarded).
    total = jnp.sum(out1[:n, 0]) + jnp.sum(out2[:n, 0])
    return total / jnp.float32(2 * n)


def simclr_loss_ref(z1: jax.Array, z2: jax.Array, temperature: float = 0.2) -> jax.Array:
    """Pure-JAX reference mirroring the PyTorch module (rank=0, world_size=1)."""
    n = z1.shape[0]
    z = jnp.concatenate([z1, z2], axis=0).astype(jnp.float32)
    z = z / jnp.maximum(jnp.linalg.norm(z, axis=1, keepdims=True), 1e-12)
    sim = (z @ z.T) / temperature
    m2 = 2 * n
    idx = jnp.arange(m2)
    diag = idx[:, None] == idx[None, :]
    pos_mask = ((idx[:, None] % n) == (idx[None, :] % n)) & (~diag)
    pos = jnp.sum(jnp.where(pos_mask, sim, 0.0), axis=1)
    masked = jnp.where(diag, -jnp.inf, sim)
    lse = jax.scipy.special.logsumexp(masked, axis=1)
    return jnp.mean(lse - pos)


if __name__ == "__main__":
    key = jax.random.PRNGKey(0)
    k1, k2 = jax.random.split(key)
    N, D = 8, 32
    Z_1 = jax.random.normal(k1, (N, D), dtype=jnp.float32)
    Z_2 = jax.random.normal(k2, (N, D), dtype=jnp.float32)

    loss = jax.block_until_ready(simclr_loss_pallas(Z_1, Z_2, temperature=0.2))
    ref = jax.block_until_ready(simclr_loss_ref(Z_1, Z_2, temperature=0.2))
    assert jnp.allclose(loss, ref, atol=1e-4, rtol=1e-4), (loss, ref)

    # Odd batch size: exercises row padding + padded-column masking.
    k3, k4 = jax.random.split(k2)
    Z_3 = jax.random.normal(k3, (13, D), dtype=jnp.float32)
    Z_4 = jax.random.normal(k4, (13, D), dtype=jnp.float32)
    loss_odd = jax.block_until_ready(simclr_loss_pallas(Z_3, Z_4, temperature=0.2))
    ref_odd = jax.block_until_ready(simclr_loss_ref(Z_3, Z_4, temperature=0.2))
    assert jnp.allclose(loss_odd, ref_odd, atol=1e-4, rtol=1e-4), (loss_odd, ref_odd)

    # bf16 MXU-operand mode (looser tolerance, ~1e-3 expected error).
    loss_bf16 = jax.block_until_ready(
        simclr_loss_pallas(Z_1, Z_2, temperature=0.2, use_bf16_matmul=True))
    assert jnp.allclose(loss_bf16, ref, atol=3e-2, rtol=3e-2), (loss_bf16, ref)

    print("KERNEL_OK")
</pallas_src>

<mosaic_0001>
module attributes {stable_mosaic.version = 11 : i64} {
  func.func @_simclr_kernel(%arg0: i32, %arg1: i32, %arg2: memref<8x128xf32, #tpu.memory_space<vmem>>, %arg3: memref<8x128xf32, #tpu.memory_space<vmem>>, %arg4: memref<16x128xf32, #tpu.memory_space<vmem>>, %arg5: memref<8x1xf32, #tpu.memory_space<vmem>>, %arg6: memref<8x1xf32, #tpu.memory_space<vmem>>, %arg7: memref<16x128xf32, #tpu.memory_space<vmem>>, %arg8: memref<8x1xf32, #tpu.memory_space<vmem>>, %arg9: memref<16x1xf32, #tpu.memory_space<vmem>>) attributes {dimension_semantics = [#tpu.dimension_semantics<parallel>, #tpu.dimension_semantics<arbitrary>], iteration_bounds = array<i64: 1, 1>, scalar_prefetch = 0 : i64, scratch_operands = 3 : i64, tpu.core_type = #tpu.core_type<tc>, window_params = [{transform_indices = @transform_0, window_bounds = array<i64: 8, 128>}, {transform_indices = @transform_1, window_bounds = array<i64: 8, 128>}, {transform_indices = @transform_2, window_bounds = array<i64: 16, 128>}, {transform_indices = @transform_3, window_bounds = array<i64: 8, 1>}, {transform_indices = @transform_4, window_bounds = array<i64: 8, 1>}]} {
    %c0_i32 = arith.constant 0 : i32
    %0 = arith.cmpi eq, %arg1, %c0_i32 : i32
    %1 = arith.extui %0 : i1 to i32
    %c0_i32_0 = arith.constant 0 : i32
    %2 = arith.cmpi ne, %1, %c0_i32_0 : i32
    scf.if %2 {
      %c0_15 = arith.constant 0 : index
      %c0_16 = arith.constant 0 : index
      %35 = vector.load %arg2[%c0_15, %c0_16] : memref<8x128xf32, #tpu.memory_space<vmem>>, vector<8x128xf32>
      %c0_17 = arith.constant 0 : index
      %c0_18 = arith.constant 0 : index
      %36 = vector.load %arg3[%c0_17, %c0_18] : memref<8x128xf32, #tpu.memory_space<vmem>>, vector<8x128xf32>
      %c0_19 = arith.constant 0 : index
      %c0_20 = arith.constant 0 : index
      %37 = vector.load %arg7[%c0_19, %c0_20] : memref<16x128xf32, #tpu.memory_space<vmem>>, vector<8x128xf32>
      tpu.vector_store %arg7[%c0_19, %c0_20], %35 {strides = array<i32>} : memref<16x128xf32, #tpu.memory_space<vmem>>, vector<8x128xf32>,
      %c8 = arith.constant 8 : index
      %c0_21 = arith.constant 0 : index
      %38 = vector.load %arg7[%c8, %c0_21] : memref<16x128xf32, #tpu.memory_space<vmem>>, vector<8x128xf32>
      tpu.vector_store %arg7[%c8, %c0_21], %36 {strides = array<i32>} : memref<16x128xf32, #tpu.memory_space<vmem>>, vector<8x128xf32>,
      %39 = arith.mulf %35, %36 : vector<8x128xf32>
      %cst_22 = arith.constant dense<0.000000e+00> : vector<8xf32>
      %40 = vector.multi_reduction <add>, %39, %cst_22 [1] : vector<8x128xf32> to vector<8xf32>
      %41 = vector.shape_cast %40 : vector<8xf32> to vector<8x1xf32>
      %c0_23 = arith.constant 0 : index
      %c0_24 = arith.constant 0 : index
      %42 = vector.load %arg8[%c0_23, %c0_24] : memref<8x1xf32, #tpu.memory_space<vmem>>, vector<8x1xf32>
      tpu.vector_store %arg8[%c0_23, %c0_24], %41 {strides = array<i32>} : memref<8x1xf32, #tpu.memory_space<vmem>>, vector<8x1xf32>,
      %cst_25 = arith.constant 0.000000e+00 : f32
      %43 = vector.broadcast %cst_25 : f32 to vector<16x1xf32>
      %c0_26 = arith.constant 0 : index
      %c0_27 = arith.constant 0 : index
      %44 = vector.load %arg9[%c0_26, %c0_27] : memref<16x1xf32, #tpu.memory_space<vmem>>, vector<16x1xf32>
      tpu.vector_store %arg9[%c0_26, %c0_27], %43 {strides = array<i32>} : memref<16x1xf32, #tpu.memory_space<vmem>>, vector<16x1xf32>,
    } else {
    }
    %c0 = arith.constant 0 : index
    %c0_1 = arith.constant 0 : index
    %3 = vector.load %arg7[%c0, %c0_1] : memref<16x128xf32, #tpu.memory_space<vmem>>, vector<16x128xf32>
    %c0_2 = arith.constant 0 : index
    %c0_3 = arith.constant 0 : index
    %4 = vector.load %arg4[%c0_2, %c0_3] : memref<16x128xf32, #tpu.memory_space<vmem>>, vector<16x128xf32>
    %cst = arith.constant dense<0.000000e+00> : vector<16x16xf32>
    %5 = tpu.matmul %3, %4, %cst {dimension_numbers = #tpu.dot_dimension_numbers<[1], [1], [0], [0], [0, 0, 1, 0], [], []>} : vector<16x128xf32>, vector<16x128xf32>, vector<16x16xf32> -> vector<16x16xf32>
    %cst_4 = arith.constant 5.000000e+00 : f32
    %6 = vector.broadcast %cst_4 : f32 to vector<16x16xf32>
    %7 = arith.subf %5, %6 : vector<16x16xf32>
    %8 = math.exp %7 : vector<16x16xf32>
    %9 = tpu.iota {dimensions = array<i32: 0>} : vector<16x1xi32>
    %c8_i32 = arith.constant 8 : i32
    %10 = arith.muli %arg0, %c8_i32 : i32
    %c8_i32_5 = arith.constant 8 : i32
    %11 = vector.broadcast %c8_i32_5 : i32 to vector<16x1xi32>
    %12 = arith.cmpi slt, %9, %11 : vector<16x1xi32>
    %c0_i32_6 = arith.constant 0 : i32
    %13 = vector.broadcast %c0_i32_6 : i32 to vector<16x1xi32>
    %14 = arith.addi %9, %13 : vector<16x1xi32>
    %15 = arith.select %12, %9, %14 : vector<16x1xi1>, vector<16x1xi32>
    %16 = vector.broadcast %10 : i32 to vector<16x1xi32>
    %17 = arith.addi %16, %15 : vector<16x1xi32>
    %18 = tpu.iota {dimensions = array<i32: 1>} : vector<1x16xi32>
    %c16_i32 = arith.constant 16 : i32
    %19 = arith.muli %arg1, %c16_i32 : i32
    %20 = vector.broadcast %19 : i32 to vector<1x16xi32>
    %21 = arith.addi %20, %18 : vector<1x16xi32>
    %22 = vector.broadcast %17 : vector<16x1xi32> to vector<16x16xi32>
    %23 = vector.broadcast %21 : vector<1x16xi32> to vector<16x16xi32>
    %24 = arith.cmpi ne, %22, %23 : vector<16x16xi32>
    %cst_7 = arith.constant 0.000000e+00 : f32
    %25 = vector.broadcast %cst_7 : f32 to vector<16x16xf32>
    %26 = arith.select %24, %8, %25 : vector<16x16xi1>, vector<16x16xf32>
    %c0_8 = arith.constant 0 : index
    %c0_9 = arith.constant 0 : index
    %27 = vector.load %arg9[%c0_8, %c0_9] : memref<16x1xf32, #tpu.memory_space<vmem>>, vector<16x1xf32>
    %cst_10 = arith.constant dense<0.000000e+00> : vector<16xf32>
    %28 = vector.multi_reduction <add>, %26, %cst_10 [1] : vector<16x16xf32> to vector<16xf32>
    %29 = vector.shape_cast %28 : vector<16xf32> to vector<16x1xf32>
    %30 = arith.addf %27, %29 : vector<16x1xf32>
    %c0_11 = arith.constant 0 : index
    %c0_12 = arith.constant 0 : index
    %31 = vector.load %arg9[%c0_11, %c0_12] : memref<16x1xf32, #tpu.memory_space<vmem>>, vector<16x1xf32>
    tpu.vector_store %arg9[%c0_11, %c0_12], %30 {strides = array<i32>} : memref<16x1xf32, #tpu.memory_space<vmem>>, vector<16x1xf32>,
    %c0_i32_13 = arith.constant 0 : i32
    %32 = arith.cmpi eq, %arg1, %c0_i32_13 : i32
    %33 = arith.extui %32 : i1 to i32
    %c0_i32_14 = arith.constant 0 : i32
    %34 = arith.cmpi ne, %33, %c0_i32_14 : i32
    scf.if %34 {
      %c0_15 = arith.constant 0 : index
      %c0_16 = arith.constant 0 : index
      %35 = vector.load %arg8[%c0_15, %c0_16] : memref<8x1xf32, #tpu.memory_space<vmem>>, vector<8x1xf32>
      %c0_17 = arith.constant 0 : index
      %c0_18 = arith.constant 0 : index
      %36 = vector.load %arg9[%c0_17, %c0_18] : memref<16x1xf32, #tpu.memory_space<vmem>>, vector<8x1xf32>
      %37 = math.log %36 : vector<8x1xf32>
      %cst_19 = arith.constant 5.000000e+00 : f32
      %38 = vector.broadcast %cst_19 : f32 to vector<8x1xf32>
      %39 = arith.addf %37, %38 : vector<8x1xf32>
      %40 = arith.subf %39, %35 : vector<8x1xf32>
      %c0_20 = arith.constant 0 : index
      %c0_21 = arith.constant 0 : index
      %41 = vector.load %arg5[%c0_20, %c0_21] : memref<8x1xf32, #tpu.memory_space<vmem>>, vector<8x1xf32>
      tpu.vector_store %arg5[%c0_20, %c0_21], %40 {strides = array<i32>} : memref<8x1xf32, #tpu.memory_space<vmem>>, vector<8x1xf32>,
      %c8 = arith.constant 8 : index
      %c0_22 = arith.constant 0 : index
      %42 = vector.load %arg9[%c8, %c0_22] : memref<16x1xf32, #tpu.memory_space<vmem>>, vector<8x1xf32>
      %43 = math.log %42 : vector<8x1xf32>
      %cst_23 = arith.constant 5.000000e+00 : f32
      %44 = vector.broadcast %cst_23 : f32 to vector<8x1xf32>
      %45 = arith.addf %43, %44 : vector<8x1xf32>
      %46 = arith.subf %45, %35 : vector<8x1xf32>
      %c0_24 = arith.constant 0 : index
      %c0_25 = arith.constant 0 : index
      %47 = vector.load %arg6[%c0_24, %c0_25] : memref<8x1xf32, #tpu.memory_space<vmem>>, vector<8x1xf32>
      tpu.vector_store %arg6[%c0_24, %c0_25], %46 {strides = array<i32>} : memref<8x1xf32, #tpu.memory_space<vmem>>, vector<8x1xf32>,
    } else {
    }
    return
  }
  func.func @transform_0(%arg0: i32, %arg1: i32) -> (i32, i32) {
    %c0_i32 = arith.constant 0 : i32
    %c0_i32_0 = arith.constant 0 : i32
    return %arg0, %c0_i32 : i32, i32
  }
  func.func @transform_1(%arg0: i32, %arg1: i32) -> (i32, i32) {
    %c1_i32 = arith.constant 1 : i32
    %0 = arith.addi %arg0, %c1_i32 : i32
    %c0_i32 = arith.constant 0 : i32
    %c0_i32_0 = arith.constant 0 : i32
    return %0, %c0_i32 : i32, i32
  }
  func.func @transform_2(%arg0: i32, %arg1: i32) -> (i32, i32) {
    %c0_i32 = arith.constant 0 : i32
    %c0_i32_0 = arith.constant 0 : i32
    return %arg1, %c0_i32 : i32, i32
  }
  func.func @transform_3(%arg0: i32, %arg1: i32) -> (i32, i32) {
    %c0_i32 = arith.constant 0 : i32
    %c0_i32_0 = arith.constant 0 : i32
    return %arg0, %c0_i32 : i32, i32
  }
  func.func @transform_4(%arg0: i32, %arg1: i32) -> (i32, i32) {
    %c0_i32 = arith.constant 0 : i32
    %c0_i32_0 = arith.constant 0 : i32
    return %arg0, %c0_i32 : i32, i32
  }
}

</mosaic_0001>

<bundles_post_ra>
// kernel: tpu_custom_call.1
= control target key start
LH: loop header
LB: loop body
LE: loop exit
PB: predicated region body
PF: predicated region fallthrough
CT: control target
= control target key end

     0   :  { %10 = vsyncpa [#allocation6], 0  ;;  %s315_s0 = inlined_call_operand.hbm [shape: f32[16,128], index: 0, kind: input, shape index: {}]   ;;  %s316_s1 = inlined_call_operand.hbm [shape: f32[16,128], index: 1, kind: input, shape index: {}]   ;;  %s317_s2 = inlined_call_operand.hbm [shape: f32[16,128], index: 2, kind: input, shape index: {}]   ;;  %s318_s3 = inlined_call_operand.vmem [shape: f32[8,1], index: 3, kind: output, shape index: {0}]   ;;  %s319_s4 = inlined_call_operand.vmem [shape: f32[8,1], index: 4, kind: output, shape index: {1}]  }
   0x1   :  { %11 = vsyncpa [#allocation8], 0  ;;  %s167_s17 = scalar_lea.hbm %s316_s1, 8  ;;  %s262_s19 = smov [#allocation7]  }
   0x2   :  { %s31_s18 = sshll.u32 %s167_s17, 4  ;;  %s33_s20 = sshll.u32 %s262_s19, 4  ;;  %s32_s18 = int_to_ptr.hbm [resolvable:$true] %s31_s18  ;;  %s34_s20 = int_to_ptr.vmem [resolvable:$true] %s33_s20 }
   0x3   :  { %36 = dma.hbm_to_vmem [thread:$0]  %s32_s18, 128, %s34_s20, [#allocation8]  }
   0x4   :  { %s17_s23 = sshll.u32 %s315_s0, 4  ;;  %s263_s24 = smov [#allocation5]   ;;  %s18_s23 = int_to_ptr.hbm [resolvable:$true] %s17_s23 }
   0x5   :  { %s19_s25 = sshll.u32 %s263_s24, 4  ;;  %s41_s28 = sshll.u32 %s317_s2, 4  ;;  %s20_s25 = int_to_ptr.vmem [resolvable:$true] %s19_s25  ;;  %s42_s28 = int_to_ptr.hbm [resolvable:$true] %s41_s28 }
   0x6   :  { %22 = dma.hbm_to_vmem [thread:$0]  %s18_s23, 128, %s20_s25, [#allocation6]  }
   0x7   :  { %s264_s1 = smov [#allocation9]   ;;  %s265_s30 = smov 128  }
   0x8   :  { %s43_s29 = sshll.u32 %s264_s1, 4  ;;  %s266_s5 = smov 8   ;;  %s44_s29 = int_to_ptr.vmem [resolvable:$true] %s43_s29 }
   0x9   :  { %49 = dma.hbm_to_vmem [thread:$0]  %s42_s28, 256, %s44_s29, [#allocation8], %s265_s30, %s265_s30, %s266_s5  }
   0xa   :  { %258 = dma.done.wait [#allocation6], 128  }
   0xb   :  { %259 = vsyncadd [#allocation6], 4294967168 }
   0xc   :  { %260 = dma.done.wait [#allocation8], 384  }
   0xd   :  { %261 = vsyncadd [#allocation8], 4294966912  ;;  %v81_v0 = vld [vmem:[#allocation9 + $0x8] sm:$0xff]  ;;  %v80_v1 = vld [vmem:[#allocation9] sm:$0xff]  ;;  %vm74_vm0 = vcmask 7168   ;;  %v267_v5 = vmov 0.0   ;;  %v111_v10 = vlaneseq }
   0xe   :  { %96 = vmatpush.xpose.msra.mxu0 %v81_v0  ;;  %170 = vmatpush.xpose.msra.mxu1 %v81_v0  ;;  %v67_v2 = vld [vmem:[#allocation5] sm:$0xff]  ;;  %v68_v3 = vld [vmem:[#allocation7] sm:$0xff]  ;;  %76 = vst.msk [vmem:[#allocation4] sm:$0xff] %vm74_vm0, %v267_v5  ;;  %vm129_vm2 = vcmask 130048  }
   0xf   :  { %v71_v4 = vmul.f32 %v68_v3, %v67_v2  ;;  %77 = vst.msk [vmem:[#allocation4 + $0x8] sm:$0xff] %vm74_vm0, %v267_v5  ;;  %v112_v13 = vshrl.u32 %v111_v10, 7  ;;  %v119_v14 = vand.u32 127, %v111_v10 }
  0x11   :  { %72 = vadd.xlane.f32.xlu1 %v71_v4  ;;  %vm123_vm1 = vcmp.ne.s32.totalorder %v112_v13, %v119_v14  ;;  %v113_v15 = vadd.s32 8, %v112_v13 }
  0x12   :  { %97 = vmatpush.xpose.msra.mxu0 %v80_v1  ;;  %171 = vmatpush.xpose.msra.mxu1 %v80_v1 }
  0x13   :  { %vm124_vm3 = vcmp.ne.s32.totalorder %v113_v15, %v119_v14 }
  0x15   :  { %98 = vmatmul.f32.vlgmr.msra.gmra.mxu0 %v67_v2  ;;  %101 = vmatmul.f32.vlgmr.msra.gmra.mxu1 %v68_v3  ;;  %v127_v23 = vld [vmem:[#allocation4] sm:$0xff] }
  0x16   :  { %v128_v26 = vld [vmem:[#allocation4 + $0x8] sm:$0xff] }
  0x84   :  { %v73_v22 = vpop.xlane.xlu1 %72 }
  0x85   :  { %75 = vst.msk [vmem:[#allocation3] sm:$0xff] %vm74_vm0, %v73_v22 }
  0x8c   :  { %v144_v33 = vld [vmem:[#allocation3] sm:$0xff] }
  0x92   :  { %v99_v6 = vpop.f32.mrf.mxu0  ;;  %v102_v7 = vpop.f32.mrf.mxu1 }
  0x93   :  { %v168_v8 = vadd.f32 -5.0, %v99_v6  ;;  %v169_v9 = vadd.f32 -5.0, %v102_v7 }
  0x95   :  { %v107_v11 = vmul.f32 1.442695, %v168_v8  ;;  %v109_v12 = vmul.f32 1.442695, %v169_v9 }
  0x97   :  { %178 = vpow2.f32 %v107_v11 }
  0x98   :  { %180 = vpow2.f32 %v109_v12 }
  0x9d   :  { %v179_v16 = vpop.eup %178 }
  0x9e   :  { %v125_v17 = vsel %vm123_vm1, %v179_v16, 0.0  ;;  %v181_v18 = vpop.eup %180 }
  0x9f   :  { %v130_v19 = vsel %vm129_vm2, %v125_v17, 0.0  ;;  %v126_v20 = vsel %vm124_vm3, %v181_v18, 0.0 }
  0xa0   :  { %131 = vadd.xlane.f32.xlu0 %v130_v19  ;;  %v133_v21 = vsel %vm129_vm2, %v126_v20, 0.0 }
  0xa8   :  { %134 = vadd.xlane.f32.xlu0 %v133_v21 }
 0x113   :  { %v132_v24 = vpop.xlane.xlu0 %131 }
 0x114   :  { %v136_v25 = vadd.f32 %v132_v24, %v127_v23 }
 0x116   :  { %139 = vst.msk [vmem:[#allocation4] sm:$0xff] %vm74_vm0, %v136_v25 }
 0x11b   :  { %v135_v27 = vpop.xlane.xlu0 %134 }
 0x11c   :  { %v137_v28 = vadd.f32 %v135_v27, %v128_v26 }
 0x11d   :  { %v145_v29 = vld [vmem:[#allocation4] sm:$0xff] }
 0x11e   :  { %140 = vst.msk [vmem:[#allocation4 + $0x8] sm:$0xff] %vm74_vm0, %v137_v28  ;;  %182 = vlog2.f32 %v145_v29 }
 0x124   :  { %v183_v30 = vpop.eup %182 }
 0x125   :  { %v147_v31 = vmul.f32 0.6931472, %v183_v30  ;;  %v151_v32 = vld [vmem:[#allocation4 + $0x8] sm:$0xff] }
 0x126   :  { %184 = vlog2.f32 %v151_v32 }
 0x127   :  { %v148_v34 = vadd.f32 5.0, %v147_v31 }
 0x129   :  { %v149_v35 = vsub.f32 %v148_v34, %v144_v33 }
 0x12b   :  { %150 = vst.msk [vmem:[%s318_s3] sm:$0xff] %vm74_vm0, %v149_v35 }
 0x12c   :  { %v185_v36 = vpop.eup %184 }
 0x12d   :  { %v153_v37 = vmul.f32 0.6931472, %v185_v36 }
 0x12f   :  { %v154_v38 = vadd.f32 5.0, %v153_v37 }
 0x131   :  { %v155_v39 = vsub.f32 %v154_v38, %v144_v33 }
 0x133   :  { %156 = vst.msk [vmem:[%s319_s4] sm:$0xff] %vm74_vm0, %v155_v39 }
 0x134   :  { %165 = vsyncpa [#allocation6], 1 }
 0x135   :  { %166 = vsyncpa [#allocation8], 1 }

</bundles_post_ra>
